<compile_context>
chip_gen: v7x
topology: tpu7x:2x2x1
jax: 0.10.0
libtpu: 0.0.40
codegen_flags: <defaults>
</compile_context>

<pallas_src>
import functools

import jax
import jax.numpy as jnp
from jax.experimental import pallas as pl
from jax.experimental.pallas import tpu as pltpu


def _round_up(a: int, m: int) -> int:
    return ((a + m - 1) // m) * m


def _series_decomp_kernel(x_ref, res_ref, trend_ref, *,
                          kernel_size: int, pad_left: int, pad_right: int):
    """One (R, F) row block: R independent series, window along lanes (F)."""
    x = x_ref[...].astype(jnp.float32)            # (R, F)
    r, f = x.shape

    # Replication pad along the lane axis, built in VMEM/vregs.
    parts = []
    if pad_left:
        parts.append(jnp.broadcast_to(x[:, :1], (r, pad_left)))
    parts.append(x)
    if pad_right:
        parts.append(jnp.broadcast_to(x[:, f - 1:f], (r, pad_right)))
    xp = jnp.concatenate(parts, axis=1) if len(parts) > 1 else x   # (R, F+k-1)

    # Stride-1 moving sum: k statically shifted adds (k is small & static).
    acc = xp[:, 0:f]
    for i in range(1, kernel_size):
        acc = acc + xp[:, i:i + f]
    trend = acc * jnp.float32(1.0 / kernel_size)   # multiply by 1/k, no divide

    res_ref[...] = (x - trend).astype(res_ref.dtype)
    trend_ref[...] = trend.astype(trend_ref.dtype)


# Conservative working-set budget so the double-buffered pipeline fits the
# default scoped VMEM on every generation (v5e's 16 MiB default is the floor,
# v7x has only 64 MiB physical VMEM).  We raise the scoped limit to 32 MiB and
# keep the live estimate well under it.
_VMEM_BUDGET_BYTES = 12 * 1024 * 1024
_MAX_ROW_BLOCK = 4096


def _pick_row_block(n_rows: int, feat: int, kernel_size: int, itemsize: int) -> int:
    # Live VMEM per row, over-estimated:
    #   pipeline buffers: 2*(1 in + 2 out) * F * itemsize
    #   f32 temps: x + xp + acc + trend + res ~= 5 * F * 4  (+ k-1 halo)
    per_row = 6 * feat * itemsize + 5 * feat * 4 + 4 * (kernel_size - 1)
    cap = max(8, _VMEM_BUDGET_BYTES // max(per_row, 1))
    r = min(_MAX_ROW_BLOCK, cap, _round_up(n_rows, 8))
    return max(8, (r // 8) * 8)


def series_decomposition(x, kernel_size: int):
    """x: (B, S, F) -> (residual, moving_mean), each (B, S, F)."""
    B, S, F = x.shape
    pad_left = (kernel_size - 1) // 2
    pad_right = kernel_size - pad_left - 1

    # Window runs within each (b, s) row -> batch & seq are fully independent:
    # flatten them into one row axis and tile it.
    N = B * S
    x2 = x.reshape(N, F)

    R = _pick_row_block(N, F, kernel_size, x.dtype.itemsize)
    Np = _round_up(N, R)
    if Np != N:
        x2 = jnp.pad(x2, ((0, Np - N), (0, 0)))

    kernel = functools.partial(_series_decomp_kernel,
                               kernel_size=kernel_size,
                               pad_left=pad_left,
                               pad_right=pad_right)

    res2, trend2 = pl.pallas_call(
        kernel,
        out_shape=(jax.ShapeDtypeStruct((Np, F), x.dtype),
                   jax.ShapeDtypeStruct((Np, F), x.dtype)),
        grid_spec=pltpu.PrefetchScalarGridSpec(
            num_scalar_prefetch=0,
            grid=(Np // R,),
            in_specs=[pl.BlockSpec((R, F), lambda i: (i, 0))],
            out_specs=[pl.BlockSpec((R, F), lambda i: (i, 0)),
                       pl.BlockSpec((R, F), lambda i: (i, 0))],
        ),
        compiler_params=pltpu.CompilerParams(
            dimension_semantics=("parallel",),
            vmem_limit_bytes=32 * 1024 * 1024,
        ),
    )(x2)

    if Np != N:
        res2 = res2[:N]
        trend2 = trend2[:N]
    return res2.reshape(B, S, F), trend2.reshape(B, S, F)


class SeriesDecompositionPallas:
    """Mirrors the PyTorch SeriesDecomposition module."""

    def __init__(self, kernel_size: int):
        self.kernel_size = kernel_size

    def __call__(self, x):
        return series_decomposition(x, self.kernel_size)


def _reference_decomposition(x, kernel_size):
    """Pure-JAX reference matching ReplicationPad1d + AvgPool1d(stride=1)."""
    pad_left = (kernel_size - 1) // 2
    pad_right = kernel_size - pad_left - 1
    xp = jnp.pad(x, ((0, 0), (0, 0), (pad_left, pad_right)), mode="edge")
    F = x.shape[-1]
    windows = jnp.stack([xp[..., i:i + F] for i in range(kernel_size)], axis=0)
    trend = jnp.mean(windows, axis=0)
    return x - trend, trend


if __name__ == "__main__":
    key = jax.random.PRNGKey(0)
    B, S, F = 2, 16, 16          # bs x seq_len x features
    kernel_size = 5
    x = jax.random.normal(key, (B, S, F), dtype=jnp.float32)

    decomp = SeriesDecompositionPallas(kernel_size)
    residual, trend = decomp(x)
    residual, trend = jax.block_until_ready((residual, trend))

    res_ref, trend_ref = _reference_decomposition(x, kernel_size)
    assert jnp.allclose(trend, trend_ref, atol=1e-4, rtol=1e-4), "trend mismatch"
    assert jnp.allclose(residual, res_ref, atol=1e-4, rtol=1e-4), "residual mismatch"
    assert jnp.allclose(residual + trend, x, atol=1e-4, rtol=1e-4), "decomposition not exact"

    print("KERNEL_OK")
</pallas_src>

<mosaic_0001>
module attributes {stable_mosaic.version = 11 : i64} {
  func.func @_series_decomp_kernel(%arg0: i32, %arg1: memref<32x16xf32, #tpu.memory_space<vmem>>, %arg2: memref<32x16xf32, #tpu.memory_space<vmem>>, %arg3: memref<32x16xf32, #tpu.memory_space<vmem>>) attributes {dimension_semantics = [#tpu.dimension_semantics<parallel>], iteration_bounds = array<i64: 1>, scalar_prefetch = 0 : i64, scratch_operands = 0 : i64, tpu.core_type = #tpu.core_type<tc>, window_params = [{transform_indices = @transform_0, window_bounds = array<i64: 32, 16>}, {transform_indices = @transform_1, window_bounds = array<i64: 32, 16>}, {transform_indices = @transform_2, window_bounds = array<i64: 32, 16>}]} {
    %c0 = arith.constant 0 : index
    %c0_0 = arith.constant 0 : index
    %0 = vector.load %arg1[%c0, %c0_0] : memref<32x16xf32, #tpu.memory_space<vmem>>, vector<32x16xf32>
    %1 = vector.extract_strided_slice %0 {offsets = [0, 0], sizes = [32, 1], strides = [1, 1]} : vector<32x16xf32> to vector<32x1xf32>
    %2 = vector.shape_cast %1 : vector<32x1xf32> to vector<32x1xf32>
    %3 = vector.broadcast %2 : vector<32x1xf32> to vector<32x2xf32>
    %4 = vector.extract_strided_slice %0 {offsets = [0, 15], sizes = [32, 1], strides = [1, 1]} : vector<32x16xf32> to vector<32x1xf32>
    %5 = vector.shape_cast %4 : vector<32x1xf32> to vector<32x1xf32>
    %6 = vector.broadcast %5 : vector<32x1xf32> to vector<32x2xf32>
    %7 = tpu.concatenate %3, %0, %6 in 1 : vector<32x2xf32>, vector<32x16xf32>, vector<32x2xf32> -> vector<32x20xf32>
    %8 = vector.extract_strided_slice %7 {offsets = [0, 0], sizes = [32, 16], strides = [1, 1]} : vector<32x20xf32> to vector<32x16xf32>
    %9 = vector.extract_strided_slice %7 {offsets = [0, 1], sizes = [32, 16], strides = [1, 1]} : vector<32x20xf32> to vector<32x16xf32>
    %10 = arith.addf %8, %9 : vector<32x16xf32>
    %11 = vector.extract_strided_slice %7 {offsets = [0, 2], sizes = [32, 16], strides = [1, 1]} : vector<32x20xf32> to vector<32x16xf32>
    %12 = arith.addf %10, %11 : vector<32x16xf32>
    %13 = vector.extract_strided_slice %7 {offsets = [0, 3], sizes = [32, 16], strides = [1, 1]} : vector<32x20xf32> to vector<32x16xf32>
    %14 = arith.addf %12, %13 : vector<32x16xf32>
    %15 = vector.extract_strided_slice %7 {offsets = [0, 4], sizes = [32, 16], strides = [1, 1]} : vector<32x20xf32> to vector<32x16xf32>
    %16 = arith.addf %14, %15 : vector<32x16xf32>
    %cst = arith.constant 2.000000e-01 : f32
    %17 = vector.broadcast %cst : f32 to vector<32x16xf32>
    %18 = arith.mulf %16, %17 : vector<32x16xf32>
    %19 = arith.subf %0, %18 : vector<32x16xf32>
    %c0_1 = arith.constant 0 : index
    %c0_2 = arith.constant 0 : index
    %20 = vector.load %arg2[%c0_1, %c0_2] : memref<32x16xf32, #tpu.memory_space<vmem>>, vector<32x16xf32>
    tpu.vector_store %arg2[%c0_1, %c0_2], %19 {strides = array<i32>} : memref<32x16xf32, #tpu.memory_space<vmem>>, vector<32x16xf32>,
    %c0_3 = arith.constant 0 : index
    %c0_4 = arith.constant 0 : index
    %21 = vector.load %arg3[%c0_3, %c0_4] : memref<32x16xf32, #tpu.memory_space<vmem>>, vector<32x16xf32>
    tpu.vector_store %arg3[%c0_3, %c0_4], %18 {strides = array<i32>} : memref<32x16xf32, #tpu.memory_space<vmem>>, vector<32x16xf32>,
    return
  }
  func.func @transform_0(%arg0: i32) -> (i32, i32) {
    %c0_i32 = arith.constant 0 : i32
    %c0_i32_0 = arith.constant 0 : i32
    return %arg0, %c0_i32 : i32, i32
  }
  func.func @transform_1(%arg0: i32) -> (i32, i32) {
    %c0_i32 = arith.constant 0 : i32
    %c0_i32_0 = arith.constant 0 : i32
    return %arg0, %c0_i32 : i32, i32
  }
  func.func @transform_2(%arg0: i32) -> (i32, i32) {
    %c0_i32 = arith.constant 0 : i32
    %c0_i32_0 = arith.constant 0 : i32
    return %arg0, %c0_i32 : i32, i32
  }
}

</mosaic_0001>

<bundles_post_ra>
// kernel: tpu_custom_call.1
= control target key start
LH: loop header
LB: loop body
LE: loop exit
PB: predicated region body
PF: predicated region fallthrough
CT: control target
= control target key end

     0   :  { %v176_v0 = vmov 0   ;;  %v177_v5 = vmov 15   ;;  %s178_s17 = smov 2   ;;  %vm62_vm0 = vcmask 15360   ;;  %vm67_vm1 = vcmask 146432   ;;  %s180_s18 = smov 126   ;;  %s266_s0 = inlined_call_operand.vmem [shape: f32[32,16], index: 0, kind: input, shape index: {}]   ;;  %s267_s2 = inlined_call_operand.vmem [shape: f32[32,16], index: 2, kind: output, shape index: {1}]   ;;  %s268_s1 = inlined_call_operand.vmem [shape: f32[32,16], index: 1, kind: output, shape index: {0}]  }
   0x1   :  { %173 = vset.pattern.permute.xlu1 %v176_v0  ;;  %172 = vset.pattern.permute.xlu0 %v176_v0  ;;  %v201_v1 = vld [vmem:[%s266_s0 + $0x10] sm:$0xff]  ;;  %v206_v2 = vld [vmem:[%s266_s0] sm:$0xff]  ;;  %v213_v3 = vld [vmem:[%s266_s0 + $0x18] sm:$0xff]  ;;  %s181_s19 = smov 125   ;;  %s182_s20 = smov 124   ;;  %vm148_vm2 = vcmask 130048  }
   0x2   :  { %26 = vperm.xlu1 %173, %v201_v1   ;;  %16 = vperm.xlu0 %172, %v206_v2   ;;  %v218_v4 = vld [vmem:[%s266_s0 + $0x8] sm:$0xff]  ;;  %s179_s0 = smov 127  }
   0x6   :  { %31 = vperm.xlu1 %173, %v213_v3   ;;  %21 = vperm.xlu0 %172, %v218_v4  }
   0xa   :  { %175 = vset.pattern.permute.xlu1 %v177_v5  ;;  %174 = vset.pattern.permute.xlu0 %v177_v5 }
   0xb   :  { %39 = vperm.xlu1 %175, %v218_v4   ;;  %35 = vperm.xlu0 %174, %v206_v2  }
   0xf   :  { %43 = vperm.xlu1 %175, %v201_v1   ;;  %47 = vperm.xlu0 %174, %v213_v3  }
  0x13   :  { %50 = vrot.lane.b32.xlu1 %v206_v2, %s178_s17  ;;  %52 = vrot.lane.b32.xlu0 %v218_v4, %s178_s17 }
  0x17   :  { %54 = vrot.lane.b32.xlu1 %v201_v1, %s178_s17  ;;  %56 = vrot.lane.b32.xlu0 %v213_v3, %s178_s17 }
  0x81   :  { %v27_v6 = vpop.permute.xlu1 %26  ;;  %v17_v7 = vpop.permute.xlu0 %16 }
  0x85   :  { %v32_v8 = vpop.permute.xlu1 %31  ;;  %v22_v9 = vpop.permute.xlu0 %21 }
  0x8a   :  { %v40_v10 = vpop.permute.xlu1 %39  ;;  %v36_v11 = vpop.permute.xlu0 %35 }
  0x8e   :  { %v44_v12 = vpop.permute.xlu1 %43  ;;  %v48_v13 = vpop.permute.xlu0 %47 }
  0x92   :  { %v51_v14 = vpop.permute.xlu1 %50  ;;  %v53_v15 = vpop.permute.xlu0 %52 }
  0x93   :  { %v63_v16 = vsel %vm62_vm0, %v17_v7, %v51_v14  ;;  %v64_v17 = vsel %vm62_vm0, %v22_v9, %v53_v15 }
  0x94   :  { %v68_v18 = vsel %vm67_vm1, %v63_v16, %v36_v11  ;;  %v69_v19 = vsel %vm67_vm1, %v64_v17, %v40_v10 }
  0x95   :  { %76 = vrot.lane.b32.xlu1 %v68_v18, %s179_s0  ;;  %78 = vrot.lane.b32.xlu0 %v69_v19, %s179_s0 }
  0x96   :  { %v55_v20 = vpop.permute.xlu1 %54  ;;  %v57_v21 = vpop.permute.xlu0 %56 }
  0x97   :  { %v65_v22 = vsel %vm62_vm0, %v27_v6, %v55_v20  ;;  %v66_v23 = vsel %vm62_vm0, %v32_v8, %v57_v21 }
  0x98   :  { %v70_v24 = vsel %vm67_vm1, %v65_v22, %v44_v12  ;;  %v71_v25 = vsel %vm67_vm1, %v66_v23, %v48_v13 }
  0x99   :  { %80 = vrot.lane.b32.xlu1 %v70_v24, %s179_s0  ;;  %82 = vrot.lane.b32.xlu0 %v71_v25, %s179_s0 }
  0x9d   :  { %92 = vrot.lane.b32.xlu1 %v68_v18, %s180_s18  ;;  %94 = vrot.lane.b32.xlu0 %v69_v19, %s180_s18 }
  0xa1   :  { %96 = vrot.lane.b32.xlu1 %v70_v24, %s180_s18  ;;  %98 = vrot.lane.b32.xlu0 %v71_v25, %s180_s18 }
  0xa5   :  { %108 = vrot.lane.b32.xlu1 %v68_v18, %s181_s19  ;;  %110 = vrot.lane.b32.xlu0 %v69_v19, %s181_s19 }
  0xa9   :  { %112 = vrot.lane.b32.xlu1 %v70_v24, %s181_s19  ;;  %114 = vrot.lane.b32.xlu0 %v71_v25, %s181_s19 }
  0xad   :  { %124 = vrot.lane.b32.xlu1 %v68_v18, %s182_s20  ;;  %126 = vrot.lane.b32.xlu0 %v69_v19, %s182_s20 }
  0xb1   :  { %128 = vrot.lane.b32.xlu1 %v70_v24, %s182_s20  ;;  %130 = vrot.lane.b32.xlu0 %v71_v25, %s182_s20 }
 0x107   :  { %v77_v26 = vpop.permute.xlu1 %76  ;;  %v79_v27 = vpop.permute.xlu0 %78 }
 0x108   :  { %v88_v36 = vadd.f32 %v77_v26, %v68_v18  ;;  %v89_v37 = vadd.f32 %v79_v27, %v69_v19 }
 0x10b   :  { %v81_v28 = vpop.permute.xlu1 %80  ;;  %v83_v29 = vpop.permute.xlu0 %82 }
 0x10c   :  { %v90_v42 = vadd.f32 %v81_v28, %v70_v24  ;;  %v91_v43 = vadd.f32 %v83_v29, %v71_v25 }
 0x10f   :  { %v93_v30 = vpop.permute.xlu1 %92  ;;  %v95_v31 = vpop.permute.xlu0 %94 }
 0x110   :  { %v104_v40 = vadd.f32 %v93_v30, %v88_v36  ;;  %v105_v41 = vadd.f32 %v95_v31, %v89_v37 }
 0x113   :  { %v97_v32 = vpop.permute.xlu1 %96  ;;  %v99_v33 = vpop.permute.xlu0 %98 }
 0x114   :  { %v106_v48 = vadd.f32 %v97_v32, %v90_v42  ;;  %v107_v49 = vadd.f32 %v99_v33, %v91_v43 }
 0x117   :  { %v109_v34 = vpop.permute.xlu1 %108  ;;  %v111_v35 = vpop.permute.xlu0 %110 }
 0x118   :  { %v120_v44 = vadd.f32 %v109_v34, %v104_v40  ;;  %v121_v45 = vadd.f32 %v111_v35, %v105_v41 }
 0x11b   :  { %v113_v38 = vpop.permute.xlu1 %112  ;;  %v115_v39 = vpop.permute.xlu0 %114 }
 0x11c   :  { %v122_v52 = vadd.f32 %v113_v38, %v106_v48  ;;  %v123_v53 = vadd.f32 %v115_v39, %v107_v49 }
 0x11f   :  { %v125_v46 = vpop.permute.xlu1 %124  ;;  %v127_v47 = vpop.permute.xlu0 %126 }
 0x120   :  { %v136_v50 = vadd.f32 %v125_v46, %v120_v44  ;;  %v137_v51 = vadd.f32 %v127_v47, %v121_v45 }
 0x122   :  { %v140_v54 = vmul.f32 0.2, %v136_v50  ;;  %v141_v55 = vmul.f32 0.2, %v137_v51 }
 0x123   :  { %v129_v56 = vpop.permute.xlu1 %128  ;;  %v131_v57 = vpop.permute.xlu0 %130 }
 0x124   :  { %v144_v58 = vsub.f32 %v206_v2, %v140_v54  ;;  %153 = vst.msk [vmem:[%s267_s2] sm:$0xff] %vm148_vm2, %v140_v54  ;;  %v145_v59 = vsub.f32 %v218_v4, %v141_v55  ;;  %154 = vst.msk [vmem:[%s267_s2 + $0x8] sm:$0xff] %vm148_vm2, %v141_v55  ;;  %v138_v60 = vadd.f32 %v129_v56, %v122_v52 }
 0x125   :  { %v139_v61 = vadd.f32 %v131_v57, %v123_v53 }
 0x126   :  { %149 = vst.msk [vmem:[%s268_s1] sm:$0xff] %vm148_vm2, %v144_v58  ;;  %150 = vst.msk [vmem:[%s268_s1 + $0x8] sm:$0xff] %vm148_vm2, %v145_v59  ;;  %v142_v62 = vmul.f32 0.2, %v138_v60 }
 0x127   :  { %v143_v63 = vmul.f32 0.2, %v139_v61 }
 0x128   :  { %v146_v0 = vsub.f32 %v201_v1, %v142_v62  ;;  %155 = vst.msk [vmem:[%s267_s2 + $0x10] sm:$0xff] %vm148_vm2, %v142_v62 }
 0x129   :  { %v147_v2 = vsub.f32 %v213_v3, %v143_v63  ;;  %156 = vst.msk [vmem:[%s267_s2 + $0x18] sm:$0xff] %vm148_vm2, %v143_v63 }
 0x12a   :  { %151 = vst.msk [vmem:[%s268_s1 + $0x10] sm:$0xff] %vm148_vm2, %v146_v0 }
 0x12b   :  { %152 = vst.msk [vmem:[%s268_s1 + $0x18] sm:$0xff] %vm148_vm2, %v147_v2 }

</bundles_post_ra>
